<compile_context>
chip_gen: v6e
topology: v6e:2x2x1
jax: 0.10.0
libtpu: 0.0.40
codegen_flags: <defaults>
</compile_context>

<pallas_src>
import jax
import jax.numpy as jnp
from jax.experimental import pallas as pl
from jax.experimental.pallas import tpu as pltpu

_LANE = 128


def _residual_1x1_kernel(x_ref, w_ref, b_ref, o_ref):
    """o = w @ x + b + x for one (C, TN) spatial tile.

    x_ref/o_ref: (C, TN), w_ref: (C_out, C_in) = (C, C), b_ref: (C, 1) f32.
    """
    x = x_ref[...]
    # Channel mixing on the MXU with f32 accumulation; memory-bound kernel, so
    # the MXU latency hides under the streaming DMAs even for tiny C.
    fn = jax.lax.dot_general(
        w_ref[...], x,
        dimension_numbers=(((1,), (0,)), ((), ())),
        preferred_element_type=jnp.float32)
    # Bias + residual folded into a single elementwise pass over the tile.
    o_ref[...] = (fn + b_ref[...] + x).astype(o_ref.dtype)


def _choose_tile_n(S, C, itemsize, const_bytes):
    """Spatial tile (lane axis): multiple of 128, VMEM-budgeted for v7x."""
    s_ceil = pl.cdiv(S, _LANE) * _LANE
    # VMEM plan targets v7x (64 MiB / TC; v5e & v6e have 128 MiB):
    #   streamed = 2 * (x tile + out tile) = 4 * C * TN * itemsize
    #   resident = weight + bias buffers (const_bytes)
    # Keep everything (plus compiler scratch headroom) around <= 40 MiB.
    total_budget = 40 * 1024 * 1024
    streamed_budget = max(4 * C * _LANE * itemsize, total_budget - const_bytes)
    tn_vmem_cap = streamed_budget // (4 * C * itemsize)
    # ~2 MiB per streamed buffer: fully amortizes the ~0.35 us per-grid-step
    # overhead while staying inside the budget above on every generation.
    tn_target = (2 * 1024 * 1024) // (C * itemsize)
    # Keep at least ~4 spatial grid steps (when S permits) so the pipeline has
    # blocks to overlap and v7x's 2 TensorCores both get work.
    tn_steps_cap = pl.cdiv(pl.cdiv(s_ceil, 4), _LANE) * _LANE
    tn = min(tn_vmem_cap, tn_target, tn_steps_cap, s_ceil)
    return max(_LANE, (tn // _LANE) * _LANE)


def residual_forward(x_nchw, w_oi, b):
    """Residual.forward(x) = fn(x) + x, fn = 1x1 conv (weight (Co,Ci), bias (Co))."""
    N, C, H, W = x_nchw.shape
    S = H * W
    dtype = x_nchw.dtype
    itemsize = x_nchw.dtype.itemsize

    # NCHW is already (N, C, H*W)-contiguous: free reshape, no HBM round trip.
    x3d = x_nchw.reshape(N, C, S)
    # Weight in the activation dtype (bf16 activations -> bf16 MXU operands,
    # f32 accumulation). Note: for bf16 activations with f32 PyTorch weights
    # this intentionally rounds the weights to bf16. Bias stays f32 (tiny).
    w_k = w_oi.astype(dtype)
    b_k = b.astype(jnp.float32).reshape(C, 1)

    def run(single_buffer_consts):
        const_bufs = 1 if single_buffer_consts else 2
        const_bytes = const_bufs * (C * C * itemsize + C * 4)
        TN = _choose_tile_n(S, C, itemsize, const_bytes)
        grid = (N, pl.cdiv(S, TN))

        const_kw = ({"pipeline_mode": pl.Buffered(1)}
                    if single_buffer_consts else {})
        streamed = 4 * C * TN * itemsize
        vmem_limit = min(60 * 1024 * 1024,
                         max(8 * 1024 * 1024,
                             streamed + const_bytes + 4 * 1024 * 1024))

        return pl.pallas_call(
            _residual_1x1_kernel,
            out_shape=jax.ShapeDtypeStruct((N, C, S), dtype),
            grid_spec=pltpu.PrefetchScalarGridSpec(
                num_scalar_prefetch=0,
                grid=grid,
                in_specs=[
                    # x tile: (C, TN), squeezed batch dim, lane-dense spatial.
                    pl.BlockSpec((None, C, TN), lambda n, j: (n, 0, j)),
                    # weight/bias: grid-invariant, resident across all steps.
                    pl.BlockSpec((C, C), lambda n, j: (0, 0), **const_kw),
                    pl.BlockSpec((C, 1), lambda n, j: (0, 0), **const_kw),
                ],
                out_specs=pl.BlockSpec((None, C, TN), lambda n, j: (n, 0, j)),
            ),
            compiler_params=pltpu.CompilerParams(
                dimension_semantics=("parallel", "parallel"),
                vmem_limit_bytes=vmem_limit),
        )(x3d, w_k, b_k)

    try:
        out3d = run(single_buffer_consts=True)
    except Exception:
        # pl.Buffered(1) / pipeline_mode unsupported on this jax: default
        # double-buffering for the (grid-invariant) weight and bias.
        out3d = run(single_buffer_consts=False)

    return out3d.reshape(N, C, H, W)


if __name__ == "__main__":
    key = jax.random.PRNGKey(0)

    def make_inputs(k, N, C, H, W, dtype):
        kx, kw, kb = jax.random.split(k, 3)
        # Integer-grid values (exactly representable through every precision
        # path: possible bf16 MXU operand rounding, f32 accumulation, output
        # cast), so kernel vs. reference is exact and tolerance-independent.
        x = jax.random.randint(kx, (N, C, H, W), -4, 5).astype(dtype)
        w = jax.random.randint(kw, (C, C), -2, 3).astype(jnp.float32) * 0.125
        bb = jax.random.randint(kb, (C,), -4, 5).astype(jnp.float32) * 0.25
        return x, w, bb

    def reference(x, w, bb):
        xf = x.astype(jnp.float32)
        return jnp.einsum("oc,nchw->nohw", w, xf) + bb[None, :, None, None] + xf

    k1, k2 = jax.random.split(key)

    # Test 1: small SEAM-like shape (N=2, C=4, 16x16); S divides the tile.
    x, w, b = make_inputs(k1, 2, 4, 16, 16, jnp.float32)
    out = jax.block_until_ready(residual_forward(x, w, b))
    assert out.shape == x.shape and out.dtype == x.dtype
    assert jnp.allclose(out.astype(jnp.float32), reference(x, w, b), atol=1e-6)

    # Test 2: C > 8 and S = 400 (not a multiple of the 128-lane tile) to
    # exercise the Pallas-masked edge block of the unpadded spatial grid.
    x, w, b = make_inputs(k2, 1, 16, 20, 20, jnp.float32)
    out = jax.block_until_ready(residual_forward(x, w, b))
    assert out.shape == x.shape and out.dtype == x.dtype
    assert jnp.allclose(out.astype(jnp.float32), reference(x, w, b), atol=1e-6)

    print("KERNEL_OK")
</pallas_src>

<mosaic_0001>
module attributes {stable_mosaic.version = 11 : i64} {
  func.func @_residual_1x1_kernel(%arg0: i32, %arg1: i32, %arg2: memref<1x4x128xf32, #tpu.memory_space<vmem>>, %arg3: memref<4x4xf32, #tpu.memory_space<vmem>>, %arg4: memref<4x1xf32, #tpu.memory_space<vmem>>, %arg5: memref<1x4x128xf32, #tpu.memory_space<vmem>>) attributes {dimension_semantics = [#tpu.dimension_semantics<parallel>, #tpu.dimension_semantics<parallel>], iteration_bounds = array<i64: 2, 2>, scalar_prefetch = 0 : i64, scratch_operands = 0 : i64, tpu.core_type = #tpu.core_type<tc>, window_params = [{transform_indices = @transform_0, window_bounds = array<i64: 1, 4, 128>}, {pipeline_mode = #tpu.pipeline_mode<synchronous>, transform_indices = @transform_1, window_bounds = array<i64: 4, 4>}, {pipeline_mode = #tpu.pipeline_mode<synchronous>, transform_indices = @transform_2, window_bounds = array<i64: 4, 1>}, {transform_indices = @transform_3, window_bounds = array<i64: 1, 4, 128>}]} {
    %c0 = arith.constant 0 : index
    %c0_0 = arith.constant 0 : index
    %c0_1 = arith.constant 0 : index
    %0 = vector.load %arg2[%c0, %c0_0, %c0_1] : memref<1x4x128xf32, #tpu.memory_space<vmem>>, vector<1x4x128xf32>
    %1 = vector.shape_cast %0 : vector<1x4x128xf32> to vector<4x128xf32>
    %c0_2 = arith.constant 0 : index
    %c0_3 = arith.constant 0 : index
    %2 = vector.load %arg3[%c0_2, %c0_3] : memref<4x4xf32, #tpu.memory_space<vmem>>, vector<4x4xf32>
    %cst = arith.constant dense<0.000000e+00> : vector<4x128xf32>
    %3 = tpu.matmul %2, %1, %cst {dimension_numbers = #tpu.dot_dimension_numbers<[1], [0], [0], [1], [0, 0, 1, 1], [], []>} : vector<4x4xf32>, vector<4x128xf32>, vector<4x128xf32> -> vector<4x128xf32>
    %c0_4 = arith.constant 0 : index
    %c0_5 = arith.constant 0 : index
    %4 = vector.load %arg4[%c0_4, %c0_5] : memref<4x1xf32, #tpu.memory_space<vmem>>, vector<4x1xf32>
    %5 = vector.broadcast %4 : vector<4x1xf32> to vector<4x128xf32>
    %6 = arith.addf %3, %5 : vector<4x128xf32>
    %7 = arith.addf %6, %1 : vector<4x128xf32>
    %c0_6 = arith.constant 0 : index
    %c0_7 = arith.constant 0 : index
    %c0_8 = arith.constant 0 : index
    %8 = vector.load %arg5[%c0_6, %c0_7, %c0_8] : memref<1x4x128xf32, #tpu.memory_space<vmem>>, vector<1x4x128xf32>
    %9 = vector.shape_cast %8 : vector<1x4x128xf32> to vector<4x128xf32>
    %10 = vector.shape_cast %7 : vector<4x128xf32> to vector<1x4x128xf32>
    tpu.vector_store %arg5[%c0_6, %c0_7, %c0_8], %10 {strides = array<i32>} : memref<1x4x128xf32, #tpu.memory_space<vmem>>, vector<1x4x128xf32>,
    return
  }
  func.func @transform_0(%arg0: i32, %arg1: i32) -> (i32, i32, i32) {
    %c0_i32 = arith.constant 0 : i32
    %c0_i32_0 = arith.constant 0 : i32
    return %arg0, %c0_i32, %arg1 : i32, i32, i32
  }
  func.func @transform_1(%arg0: i32, %arg1: i32) -> (i32, i32) {
    %c0_i32 = arith.constant 0 : i32
    %c0_i32_0 = arith.constant 0 : i32
    %c0_i32_1 = arith.constant 0 : i32
    return %c0_i32, %c0_i32_0 : i32, i32
  }
  func.func @transform_2(%arg0: i32, %arg1: i32) -> (i32, i32) {
    %c0_i32 = arith.constant 0 : i32
    %c0_i32_0 = arith.constant 0 : i32
    %c0_i32_1 = arith.constant 0 : i32
    return %c0_i32, %c0_i32_0 : i32, i32
  }
  func.func @transform_3(%arg0: i32, %arg1: i32) -> (i32, i32, i32) {
    %c0_i32 = arith.constant 0 : i32
    %c0_i32_0 = arith.constant 0 : i32
    return %arg0, %c0_i32, %arg1 : i32, i32, i32
  }
}

module attributes {stable_mosaic.version = 11 : i64} {
  func.func @_residual_1x1_kernel(%arg0: i32, %arg1: i32, %arg2: memref<1x4x128xf32, #tpu.memory_space<vmem>>, %arg3: memref<4x4xf32, #tpu.memory_space<vmem>>, %arg4: memref<4x1xf32, #tpu.memory_space<vmem>>, %arg5: memref<1x4x128xf32, #tpu.memory_space<vmem>>) attributes {dimension_semantics = [#tpu.dimension_semantics<parallel>, #tpu.dimension_semantics<parallel>], iteration_bounds = array<i64: 2, 2>, scalar_prefetch = 0 : i64, scratch_operands = 0 : i64, tpu.core_type = #tpu.core_type<tc>, window_params = [{transform_indices = @transform_0, window_bounds = array<i64: 1, 4, 128>}, {pipeline_mode = #tpu.pipeline_mode<synchronous>, transform_indices = @transform_1, window_bounds = array<i64: 4, 4>}, {pipeline_mode = #tpu.pipeline_mode<synchronous>, transform_indices = @transform_2, window_bounds = array<i64: 4, 1>}, {transform_indices = @transform_3, window_bounds = array<i64: 1, 4, 128>}]} {
    %c0 = arith.constant 0 : index
    %c0_0 = arith.constant 0 : index
    %c0_1 = arith.constant 0 : index
    %0 = vector.load %arg2[%c0, %c0_0, %c0_1] : memref<1x4x128xf32, #tpu.memory_space<vmem>>, vector<1x4x128xf32>
    %1 = vector.shape_cast %0 : vector<1x4x128xf32> to vector<4x128xf32>
    %c0_2 = arith.constant 0 : index
    %c0_3 = arith.constant 0 : index
    %2 = vector.load %arg3[%c0_2, %c0_3] : memref<4x4xf32, #tpu.memory_space<vmem>>, vector<4x4xf32>
    %cst = arith.constant dense<0.000000e+00> : vector<4x128xf32>
    %3 = tpu.matmul %2, %1, %cst {dimension_numbers = #tpu.dot_dimension_numbers<[1], [0], [0], [1], [0, 0, 1, 1], [], []>} : vector<4x4xf32>, vector<4x128xf32>, vector<4x128xf32> -> vector<4x128xf32>
    %c0_4 = arith.constant 0 : index
    %c0_5 = arith.constant 0 : index
    %4 = vector.load %arg4[%c0_4, %c0_5] : memref<4x1xf32, #tpu.memory_space<vmem>>, vector<4x1xf32>
    %5 = vector.broadcast %4 : vector<4x1xf32> to vector<4x128xf32>
    %6 = arith.addf %3, %5 : vector<4x128xf32>
    %7 = arith.addf %6, %1 : vector<4x128xf32>
    %c0_6 = arith.constant 0 : index
    %c0_7 = arith.constant 0 : index
    %c0_8 = arith.constant 0 : index
    %8 = vector.load %arg5[%c0_6, %c0_7, %c0_8] : memref<1x4x128xf32, #tpu.memory_space<vmem>>, vector<1x4x128xf32>
    %9 = vector.shape_cast %8 : vector<1x4x128xf32> to vector<4x128xf32>
    %10 = vector.shape_cast %7 : vector<4x128xf32> to vector<1x4x128xf32>
    tpu.vector_store %arg5[%c0_6, %c0_7, %c0_8], %10 {strides = array<i32>} : memref<1x4x128xf32, #tpu.memory_space<vmem>>, vector<1x4x128xf32>,
    return
  }
  func.func @transform_0(%arg0: i32, %arg1: i32) -> (i32, i32, i32) {
    %c0_i32 = arith.constant 0 : i32
    %c0_i32_0 = arith.constant 0 : i32
    return %arg0, %c0_i32, %arg1 : i32, i32, i32
  }
  func.func @transform_1(%arg0: i32, %arg1: i32) -> (i32, i32) {
    %c0_i32 = arith.constant 0 : i32
    %c0_i32_0 = arith.constant 0 : i32
    %c0_i32_1 = arith.constant 0 : i32
    return %c0_i32, %c0_i32_0 : i32, i32
  }
  func.func @transform_2(%arg0: i32, %arg1: i32) -> (i32, i32) {
    %c0_i32 = arith.constant 0 : i32
    %c0_i32_0 = arith.constant 0 : i32
    %c0_i32_1 = arith.constant 0 : i32
    return %c0_i32, %c0_i32_0 : i32, i32
  }
  func.func @transform_3(%arg0: i32, %arg1: i32) -> (i32, i32, i32) {
    %c0_i32 = arith.constant 0 : i32
    %c0_i32_0 = arith.constant 0 : i32
    return %arg0, %c0_i32, %arg1 : i32, i32, i32
  }
}

</mosaic_0001>

<bundles_post_ra>
// kernel: tpu_custom_call.1
= control target key start
LH: loop header
LB: loop body
LE: loop exit
PB: predicated region body
PF: predicated region fallthrough
CT: control target
= control target key end

     0   :  { %8 = vsyncpa [#allocation3], 0  ;;  %s812_s0 = inlined_call_operand.hbm [shape: f32[2,4,256], index: 0, kind: input, shape index: {}]   ;;  %s813_s1 = inlined_call_operand.vmem [shape: f32[4,4], index: 1, kind: input, shape index: {}]   ;;  %s814_s2 = inlined_call_operand.vmem [shape: f32[4,1], index: 2, kind: input, shape index: {}]   ;;  %s815_s3 = inlined_call_operand.hbm [shape: f32[2,4,256], index: 3, kind: output, shape index: {}]  }
   0x1   :  { %10 = vsyncpa [#allocation3 + $0x1], 0 }
   0x2   :  { %11 = vsyncpa [#allocation4], 0 }
   0x3   :  { %13 = vsyncpa [#allocation4 + $0x1], 0  ;;  %s650_s12 = smov 0   ;;  %s652_s13 = smov 0  }
   0x4   :  { %s654_s14 = smov 0   ;;  %s656_s15 = smov 0  }
   0x5   :  { %s658_s16 = smov 0   ;;  %s660_s17 = smov 0  }
   0x6   :  { %s662_s18 = smov 0   ;;  %s664_s19 = smov 0  }
   0x7 LB: > { %s393_s20 = sadd.s32 4294967295, %s623_s19   ;;  %s394_s21 = sadd.s32 4294967294, %s623_s19   ;;  %s623_s19 = sphi %s664_s19, %s19_s19   ;;  %s619_s18 = sphi %s662_s18, %s831_s18   ;;  %s615_s17 = sphi %s660_s17, %s830_s17   ;;  %s611_s16 = sphi %s658_s16, %s829_s16   ;;  %s607_s15 = sphi %s656_s15, %s828_s15   ;;  %s603_s14 = sphi %s654_s14, %s827_s14   ;;  %s599_s13 = sphi %s652_s13, %s826_s13   ;;  %s595_s12 = sphi %s650_s12, %s825_s12  }
   0x8   : > { %s28_s22 = sadd.s32 1, %s615_s17  ;;  %s31_s23 = sadd.s32 1, %s619_s18 }
   0x9   : > { %p29_p0 = scmp.ge.s32.totalorder %s28_s22, 2  ;;  %s40_s24 = sadd.s32 1, %s603_s14 }
   0xa   : > { %p47_p1 = scmp.ne.s32.totalorder %s603_s14, %s599_s13  ;;  %p48_p2 = scmp.eq.s32.totalorder %s623_s19, 0 }
   0xb   : > { %s833_s22 = smov (%p29_p0, %s28_s22), 0  ;;  %s835_s23 = smov (!%p29_p0, %s31_s23), %s619_s18 }
   0xc   : > { %s36_s25 = ssub.s32 %s615_s17, %s833_s22  ;;  %p703_p3 = por %p48_p2, %p47_p1 }
   0xd   : > { %p33_p4 = scmp.ge.s32.totalorder %s835_s23, 2  ;;  %p53_p5 = scmp.ne.s32.totalorder %s599_s13, %s595_s12 }
   0xe   : > { %p54_p6 = scmp.eq.s32.totalorder %s393_s20, 0  ;;  %p121_p7 = scmp.eq.s32.totalorder %s393_s20, 3 }
   0xf   : > { %s837_s23 = smov (%p33_p4, %s835_s23), 0  ;;  %p127_p10 = scmp.eq.s32.totalorder %s394_s21, 3 }
  0x10   : > { %818 = sst [smem:[#allocation8_spill]] %s837_s23  ;;  %p711_p8 = por %p54_p6, %p53_p5 }
  0x11   : > { %p715_p9 = por %p121_p7, %p47_p1  ;;  %s35_s29 = ssub.s32 %s619_s18, %s837_s23 }
  0x12   : > { %s37_s30 = sor.u32 %s36_s25, %s35_s29  ;;  %p721_p12 = por %p127_p10, %p53_p5 }
  0x13   : > { %p38_p11 = scmp.eq.s32.totalorder %s37_s30, 0  ;;  %p429_p13 = scmp.lt.s32.totalorder %s623_s19, 4 }
  0x14   : > { %s821_s4 = scalar_select %p721_p12, 1, 0 }
  0x15   : > { %s153_s5 = sand.u32 1, %s603_s14   ;;  %s398_s8 = sshll.u32 %s619_s18, 1 }
  0x16   : > { %s728_s6 = scalar_select %p38_p11, %s603_s14, %s40_s24  }
  0x17   : > { %s397_s7 = sshll.u32 %s153_s5, 2  ;;  %s162_s9 = sadd.s32 %s615_s17, %s398_s8 }
  0x18   : > { %s157_s10 = scalar_lea.vmem [#allocation2], %s397_s7  ;;  %s399_s20 = sshll.u32 %s162_s9, 6 }
  0x19   : > { %s166_s11 = sshll.u32 %s157_s10, 4  ;;  %s164_s25 = scalar_lea.hbm %s812_s0, %s399_s20  ;;  %s167_s11 = int_to_ptr.vmem [resolvable:$true] %s166_s11 }
  0x1a   : > { %p737_p0 = pnand %p429_p13, %p703_p3  ;;  %p400_p1 = scmp.ge.s32.totalorder %s623_s19, 1 }
  0x1b   : > { %p171_p2 = scmp.lt.s32.totalorder %s623_s19, 5  ;;  %s154_s24 = scalar_lea.sflag [#allocation3], %s153_s5 }
  0x1c   : > { %p501_p4 = pneg %p737_p0  ;;  %s512_s30 = scalar_lea.vmem %s167_s11, 64 }
  0x1d   : > { %p513_p5 = scmp.ne.s32.totalorder %s167_s11, %s512_s30  ;;  %s625_s7 = smov [#allocation2]  }
  0x1e   : > { %s517_s8 = sshll.u32 %s625_s7, 4  ;;  %s518_s8 = int_to_ptr.vmem [resolvable:$false] %s517_s8 }
  0x1f   : > { %p515_p6 = pnand %p513_p5, %p501_p4  ;;  %s519_s23 = scalar_lea.vmem %s518_s8, 128 }
  0x20   : > { %p520_p10 = scmp.lt.s32.totalorder %s167_s11, %s518_s8  ;;  %p521_p11 = scmp.lt.s32.totalorder %s519_s23, %s512_s30 }
  0x21   : > { %p516_p7 = pneg %p515_p6 }
  0x22   : > { %p522_p3 = por %p521_p11, %p520_p10 }
  0x24   : > { %p523_p13 = pnand %p522_p3, %p516_p7 }
  0x26   : > { %526 = shalt.err (!%p523_p13)
}
  0x27   : > { %424 = dma.hbm_to_vmem [thread:$0]  (!%p737_p0), %s164_s25, 64, %s167_s11, %s154_s24  }
  0x28   : > { %p172_p12 = pnand %p400_p1, %p171_p2 }
  0x29   : > { %s752_s26 = sand.u32 (!%p172_p12), 1, %s599_s13  }
  0x2a   : > { %175 = sbr.rel (%p172_p12) target bundleno = 261 (0x105), region = 32  ;;  %s401_s5 = sshll.u32 (!%p172_p12), %s752_s26, 2 }
  0x2b   : > { %s178_s9 = scalar_lea.sflag (!%p172_p12), [#allocation3], %s752_s26  ;;  %s181_s10 = scalar_lea.vmem (!%p172_p12), [#allocation2], %s401_s5 }
  0x2f   : > { %586 = dma.done.wait (%p711_p8), %s178_s9, 64  }
  0x30   : > { %588 = vsyncadd (%p711_p8), %s178_s9, 4294967232  ;;  %v626_v0 = vmov 0.0   ;;  %vm627_vm0 = vmmov 0   ;;  %v628_v1 = vmov 0   ;;  %vm216_vm1 = vcmask 1043456   ;;  %s406_s27 = sshll.u32 %s611_s16, 1 }
  0x31   : > { %412 = vmatprep.subr.mxu0 %v626_v0  ;;  %414 = vmatprep.mubr.msk.f32.mxu0 %vm627_vm0, %v626_v0  ;;  %vm212_vm2 = vcmask 31744   ;;  %v204_v2 = vld [vmem:[%s181_s10] sm:$0xf]  ;;  %s304_s29 = sadd.s32 %s607_s15, %s406_s27  ;;  %s203_s30 = scalar_lea.vmem [#allocation5], %s401_s5 }
  0x32   : > { %498 = vset.pattern.permute.xlu0 %v628_v1  ;;  %v205_v3 = vld [vmem:[%s813_s1] sm:$0xf]  ;;  %413 = vmatpush3.msk.msra.mxu0 %vm216_vm1, %v204_v2  ;;  %s407_s24 = sshll.u32 %s304_s29, 6  ;;  %s308_s7 = sshll.u32 %s203_s30, 4  ;;  %s309_s7 = int_to_ptr.vmem [resolvable:$true] %s308_s7 }
  0x33   : > { %v206_v4 = vld [vmem:[%s814_s2] sm:$0xf]  ;;  %415 = vmatmul.mubr.msk.f32.vlgmr.msra.gmra.mxu0 %vm212_vm2, %v205_v3  ;;  %s306_s9 = scalar_lea.hbm %s815_s3, %s407_s24  ;;  %s293_s10 = scalar_lea.sflag [#allocation4], %s752_s26 }
  0x34   : > { %209 = vperm.xlu0 %498, %v206_v4   ;;  %s527_s11 = scalar_lea.vmem %s309_s7, 64  ;;  %s629_s15 = smov [#allocation5]  }
  0x35   : > { %p528_p8 = scmp.ne.s32.totalorder %s309_s7, %s527_s11  ;;  %s531_s16 = sshll.u32 %s629_s15, 4  ;;  %s532_s16 = int_to_ptr.vmem [resolvable:$false] %s531_s16 }
  0x36   : > { %s533_s5 = scalar_lea.vmem %s532_s16, 128  ;;  %p534_p1 = scmp.lt.s32.totalorder %s309_s7, %s532_s16 }
  0x37   : > { %p529_p12 = pnand %p528_p8, %p715_p9  ;;  %p535_p2 = scmp.lt.s32.totalorder %s533_s5, %s527_s11 }
  0x39   : > { %p530_p0 = pneg %p529_p12  ;;  %p536_p4 = por %p535_p2, %p534_p1 }
  0x3b   : > { %p537_p5 = pnand %p536_p4, %p530_p0 }
  0xaf   : > { %v210_v5 = vpop.permute.xlu0 %209 }
  0xf3   : > { %v286_v6 = vpop.f32.mrf.mxu0 }
  0xf4   : > { %v287_v7 = vadd.f32 %v286_v6, %v210_v5 }
  0xf5   : > { %v416_v8 = vpop.f32.mrf.mxu0 }
  0xf6   : > { %v290_v9 = vadd.f32 %v287_v7, %v204_v2 }
  0xf8   : > { %291 = vst [vmem:[%s203_s30] sm:$0xf] %v290_v9 }
  0xf9   : > { %540 = shalt.err (!%p537_p5)
}
  0xfa   : > { %s541_s20 = scalar_lea.hbm %s306_s9, 64  ;;  %s545_s25 = scalar_lea.hbm %s815_s3, 256 }
  0xfb   : > { %p542_p6 = scmp.ne.s32.totalorder %s306_s9, %s541_s20  ;;  %p546_p11 = scmp.lt.s32.totalorder %s306_s9, %s815_s3 }
  0xfc   : > { %p547_p3 = scmp.lt.s32.totalorder %s545_s25, %s541_s20 }
  0xfd   : > { %p543_p7 = pnand %p542_p6, %p715_p9 }
  0xfe   : > { %p548_p13 = por %p547_p3, %p546_p11 }
  0xff   : > { %p544_p10 = pneg %p543_p7 }
 0x101   : > { %p549_p8 = pnand %p548_p13, %p544_p10 }
 0x103   : > { %552 = shalt.err (!%p549_p8)
}
 0x104   : > { %419 = dma.vmem_to_hbm [thread:$0]  (%p715_p9), %s309_s7, 64, %s306_s9, %s293_s10  }
 0x105 PF: > { %p430_p12 = scmp.ge.s32.totalorder %s623_s19, 2  ;;  %s320_s24 = sand.u32 1, %s595_s12  }
 0x106   : > { %p823_p0 = scmp.ne.s32.totalorder %s821_s4, 0  ;;  %s321_s30 = scalar_lea.sflag [#allocation4], %s320_s24 }
 0x108   : > { %p426_p1 = pnand %p430_p12, %p823_p0 }
 0x10a   : > { %p427_p2 = pneg %p426_p1 }
 0x10c   : > { %590 = dma.done.wait (%p427_p2), %s321_s30, 64  }
 0x10d   : > { %592 = vsyncadd (%p427_p2), %s321_s30, 4294967232  ;;  %s19_s19 = sadd.s32 1, %s623_s19   ;;  %s824_s28 = sld [smem:[#allocation8_spill]] }
 0x10e   : > { %p16_p4 = scmp.ge.s32.totalorder %s19_s19, 6   ;;  %s825_s12 = smov %s599_s13 }
 0x10f   : > { %s826_s13 = smov %s603_s14  ;;  %s827_s14 = smov %s728_s6 }
 0x110   : > { %s828_s15 = smov %s615_s17  ;;  %s829_s16 = smov %s619_s18 }
 0x111   : > { %s830_s17 = smov %s833_s22  ;;  %18 = sbr.rel (!%p16_p4) target bundleno = 7 (0x7), region = 77 }
 0x113   : > { %s831_s18 = smov %s824_s28 }
 0x116   :  { %326 = vsyncpa [#allocation3], 1 }
 0x117   :  { %328 = vsyncpa [#allocation3 + $0x1], 1 }
 0x118   :  { %329 = vsyncpa [#allocation4], 1 }
 0x119   :  { %331 = vsyncpa [#allocation4 + $0x1], 1 }

// kernel: tpu_custom_call.1
= control target key start
LH: loop header
LB: loop body
LE: loop exit
PB: predicated region body
PF: predicated region fallthrough
CT: control target
= control target key end

     0   :  { %8 = vsyncpa [#allocation3], 0  ;;  %s812_s0 = inlined_call_operand.hbm [shape: f32[2,4,256], index: 0, kind: input, shape index: {}]   ;;  %s813_s1 = inlined_call_operand.vmem [shape: f32[4,4], index: 1, kind: input, shape index: {}]   ;;  %s814_s2 = inlined_call_operand.vmem [shape: f32[4,1], index: 2, kind: input, shape index: {}]   ;;  %s815_s3 = inlined_call_operand.hbm [shape: f32[2,4,256], index: 3, kind: output, shape index: {}]  }
   0x1   :  { %10 = vsyncpa [#allocation3 + $0x1], 0 }
   0x2   :  { %11 = vsyncpa [#allocation4], 0 }
   0x3   :  { %13 = vsyncpa [#allocation4 + $0x1], 0  ;;  %s650_s12 = smov 0   ;;  %s652_s13 = smov 0  }
   0x4   :  { %s654_s14 = smov 0   ;;  %s656_s15 = smov 0  }
   0x5   :  { %s658_s16 = smov 0   ;;  %s660_s17 = smov 0  }
   0x6   :  { %s662_s18 = smov 0   ;;  %s664_s19 = smov 0  }
   0x7 LB: > { %s393_s20 = sadd.s32 4294967295, %s623_s19   ;;  %s394_s21 = sadd.s32 4294967294, %s623_s19   ;;  %s623_s19 = sphi %s664_s19, %s19_s19   ;;  %s619_s18 = sphi %s662_s18, %s831_s18   ;;  %s615_s17 = sphi %s660_s17, %s830_s17   ;;  %s611_s16 = sphi %s658_s16, %s829_s16   ;;  %s607_s15 = sphi %s656_s15, %s828_s15   ;;  %s603_s14 = sphi %s654_s14, %s827_s14   ;;  %s599_s13 = sphi %s652_s13, %s826_s13   ;;  %s595_s12 = sphi %s650_s12, %s825_s12  }
   0x8   : > { %s28_s22 = sadd.s32 1, %s615_s17  ;;  %s31_s23 = sadd.s32 1, %s619_s18 }
   0x9   : > { %p29_p0 = scmp.ge.s32.totalorder %s28_s22, 2  ;;  %s40_s24 = sadd.s32 1, %s603_s14 }
   0xa   : > { %p47_p1 = scmp.ne.s32.totalorder %s603_s14, %s599_s13  ;;  %p48_p2 = scmp.eq.s32.totalorder %s623_s19, 0 }
   0xb   : > { %s833_s22 = smov (%p29_p0, %s28_s22), 0  ;;  %s835_s23 = smov (!%p29_p0, %s31_s23), %s619_s18 }
   0xc   : > { %s36_s25 = ssub.s32 %s615_s17, %s833_s22  ;;  %p703_p3 = por %p48_p2, %p47_p1 }
   0xd   : > { %p33_p4 = scmp.ge.s32.totalorder %s835_s23, 2  ;;  %p53_p5 = scmp.ne.s32.totalorder %s599_s13, %s595_s12 }
   0xe   : > { %p54_p6 = scmp.eq.s32.totalorder %s393_s20, 0  ;;  %p121_p7 = scmp.eq.s32.totalorder %s393_s20, 3 }
   0xf   : > { %s837_s23 = smov (%p33_p4, %s835_s23), 0  ;;  %p127_p10 = scmp.eq.s32.totalorder %s394_s21, 3 }
  0x10   : > { %818 = sst [smem:[#allocation8_spill]] %s837_s23  ;;  %p711_p8 = por %p54_p6, %p53_p5 }
  0x11   : > { %p715_p9 = por %p121_p7, %p47_p1  ;;  %s35_s29 = ssub.s32 %s619_s18, %s837_s23 }
  0x12   : > { %s37_s30 = sor.u32 %s36_s25, %s35_s29  ;;  %p721_p12 = por %p127_p10, %p53_p5 }
  0x13   : > { %p38_p11 = scmp.eq.s32.totalorder %s37_s30, 0  ;;  %p429_p13 = scmp.lt.s32.totalorder %s623_s19, 4 }
  0x14   : > { %s821_s4 = scalar_select %p721_p12, 1, 0 }
  0x15   : > { %s153_s5 = sand.u32 1, %s603_s14   ;;  %s398_s8 = sshll.u32 %s619_s18, 1 }
  0x16   : > { %s728_s6 = scalar_select %p38_p11, %s603_s14, %s40_s24  }
  0x17   : > { %s397_s7 = sshll.u32 %s153_s5, 2  ;;  %s162_s9 = sadd.s32 %s615_s17, %s398_s8 }
  0x18   : > { %s157_s10 = scalar_lea.vmem [#allocation2], %s397_s7  ;;  %s399_s20 = sshll.u32 %s162_s9, 6 }
  0x19   : > { %s166_s11 = sshll.u32 %s157_s10, 4  ;;  %s164_s25 = scalar_lea.hbm %s812_s0, %s399_s20  ;;  %s167_s11 = int_to_ptr.vmem [resolvable:$true] %s166_s11 }
  0x1a   : > { %p737_p0 = pnand %p429_p13, %p703_p3  ;;  %p400_p1 = scmp.ge.s32.totalorder %s623_s19, 1 }
  0x1b   : > { %p171_p2 = scmp.lt.s32.totalorder %s623_s19, 5  ;;  %s154_s24 = scalar_lea.sflag [#allocation3], %s153_s5 }
  0x1c   : > { %p501_p4 = pneg %p737_p0  ;;  %s512_s30 = scalar_lea.vmem %s167_s11, 64 }
  0x1d   : > { %p513_p5 = scmp.ne.s32.totalorder %s167_s11, %s512_s30  ;;  %s625_s7 = smov [#allocation2]  }
  0x1e   : > { %s517_s8 = sshll.u32 %s625_s7, 4  ;;  %s518_s8 = int_to_ptr.vmem [resolvable:$false] %s517_s8 }
  0x1f   : > { %p515_p6 = pnand %p513_p5, %p501_p4  ;;  %s519_s23 = scalar_lea.vmem %s518_s8, 128 }
  0x20   : > { %p520_p10 = scmp.lt.s32.totalorder %s167_s11, %s518_s8  ;;  %p521_p11 = scmp.lt.s32.totalorder %s519_s23, %s512_s30 }
  0x21   : > { %p516_p7 = pneg %p515_p6 }
  0x22   : > { %p522_p3 = por %p521_p11, %p520_p10 }
  0x24   : > { %p523_p13 = pnand %p522_p3, %p516_p7 }
  0x26   : > { %526 = shalt.err (!%p523_p13)
}
  0x27   : > { %424 = dma.hbm_to_vmem [thread:$0]  (!%p737_p0), %s164_s25, 64, %s167_s11, %s154_s24  }
  0x28   : > { %p172_p12 = pnand %p400_p1, %p171_p2 }
  0x29   : > { %s752_s26 = sand.u32 (!%p172_p12), 1, %s599_s13  }
  0x2a   : > { %175 = sbr.rel (%p172_p12) target bundleno = 261 (0x105), region = 32  ;;  %s401_s5 = sshll.u32 (!%p172_p12), %s752_s26, 2 }
  0x2b   : > { %s178_s9 = scalar_lea.sflag (!%p172_p12), [#allocation3], %s752_s26  ;;  %s181_s10 = scalar_lea.vmem (!%p172_p12), [#allocation2], %s401_s5 }
  0x2f   : > { %586 = dma.done.wait (%p711_p8), %s178_s9, 64  }
  0x30   : > { %588 = vsyncadd (%p711_p8), %s178_s9, 4294967232  ;;  %v626_v0 = vmov 0.0   ;;  %vm627_vm0 = vmmov 0   ;;  %v628_v1 = vmov 0   ;;  %vm216_vm1 = vcmask 1043456   ;;  %s406_s27 = sshll.u32 %s611_s16, 1 }
  0x31   : > { %412 = vmatprep.subr.mxu0 %v626_v0  ;;  %414 = vmatprep.mubr.msk.f32.mxu0 %vm627_vm0, %v626_v0  ;;  %vm212_vm2 = vcmask 31744   ;;  %v204_v2 = vld [vmem:[%s181_s10] sm:$0xf]  ;;  %s304_s29 = sadd.s32 %s607_s15, %s406_s27  ;;  %s203_s30 = scalar_lea.vmem [#allocation5], %s401_s5 }
  0x32   : > { %498 = vset.pattern.permute.xlu0 %v628_v1  ;;  %v205_v3 = vld [vmem:[%s813_s1] sm:$0xf]  ;;  %413 = vmatpush3.msk.msra.mxu0 %vm216_vm1, %v204_v2  ;;  %s407_s24 = sshll.u32 %s304_s29, 6  ;;  %s308_s7 = sshll.u32 %s203_s30, 4  ;;  %s309_s7 = int_to_ptr.vmem [resolvable:$true] %s308_s7 }
  0x33   : > { %v206_v4 = vld [vmem:[%s814_s2] sm:$0xf]  ;;  %415 = vmatmul.mubr.msk.f32.vlgmr.msra.gmra.mxu0 %vm212_vm2, %v205_v3  ;;  %s306_s9 = scalar_lea.hbm %s815_s3, %s407_s24  ;;  %s293_s10 = scalar_lea.sflag [#allocation4], %s752_s26 }
  0x34   : > { %209 = vperm.xlu0 %498, %v206_v4   ;;  %s527_s11 = scalar_lea.vmem %s309_s7, 64  ;;  %s629_s15 = smov [#allocation5]  }
  0x35   : > { %p528_p8 = scmp.ne.s32.totalorder %s309_s7, %s527_s11  ;;  %s531_s16 = sshll.u32 %s629_s15, 4  ;;  %s532_s16 = int_to_ptr.vmem [resolvable:$false] %s531_s16 }
  0x36   : > { %s533_s5 = scalar_lea.vmem %s532_s16, 128  ;;  %p534_p1 = scmp.lt.s32.totalorder %s309_s7, %s532_s16 }
  0x37   : > { %p529_p12 = pnand %p528_p8, %p715_p9  ;;  %p535_p2 = scmp.lt.s32.totalorder %s533_s5, %s527_s11 }
  0x39   : > { %p530_p0 = pneg %p529_p12  ;;  %p536_p4 = por %p535_p2, %p534_p1 }
  0x3b   : > { %p537_p5 = pnand %p536_p4, %p530_p0 }
  0xaf   : > { %v210_v5 = vpop.permute.xlu0 %209 }
  0xf3   : > { %v286_v6 = vpop.f32.mrf.mxu0 }
  0xf4   : > { %v287_v7 = vadd.f32 %v286_v6, %v210_v5 }
  0xf5   : > { %v416_v8 = vpop.f32.mrf.mxu0 }
  0xf6   : > { %v290_v9 = vadd.f32 %v287_v7, %v204_v2 }
  0xf8   : > { %291 = vst [vmem:[%s203_s30] sm:$0xf] %v290_v9 }
  0xf9   : > { %540 = shalt.err (!%p537_p5)
}
  0xfa   : > { %s541_s20 = scalar_lea.hbm %s306_s9, 64  ;;  %s545_s25 = scalar_lea.hbm %s815_s3, 256 }
  0xfb   : > { %p542_p6 = scmp.ne.s32.totalorder %s306_s9, %s541_s20  ;;  %p546_p11 = scmp.lt.s32.totalorder %s306_s9, %s815_s3 }
  0xfc   : > { %p547_p3 = scmp.lt.s32.totalorder %s545_s25, %s541_s20 }
  0xfd   : > { %p543_p7 = pnand %p542_p6, %p715_p9 }
  0xfe   : > { %p548_p13 = por %p547_p3, %p546_p11 }
  0xff   : > { %p544_p10 = pneg %p543_p7 }
 0x101   : > { %p549_p8 = pnand %p548_p13, %p544_p10 }
 0x103   : > { %552 = shalt.err (!%p549_p8)
}
 0x104   : > { %419 = dma.vmem_to_hbm [thread:$0]  (%p715_p9), %s309_s7, 64, %s306_s9, %s293_s10  }
 0x105 PF: > { %p430_p12 = scmp.ge.s32.totalorder %s623_s19, 2  ;;  %s320_s24 = sand.u32 1, %s595_s12  }
 0x106   : > { %p823_p0 = scmp.ne.s32.totalorder %s821_s4, 0  ;;  %s321_s30 = scalar_lea.sflag [#allocation4], %s320_s24 }
 0x108   : > { %p426_p1 = pnand %p430_p12, %p823_p0 }
 0x10a   : > { %p427_p2 = pneg %p426_p1 }
 0x10c   : > { %590 = dma.done.wait (%p427_p2), %s321_s30, 64  }
 0x10d   : > { %592 = vsyncadd (%p427_p2), %s321_s30, 4294967232  ;;  %s19_s19 = sadd.s32 1, %s623_s19   ;;  %s824_s28 = sld [smem:[#allocation8_spill]] }
 0x10e   : > { %p16_p4 = scmp.ge.s32.totalorder %s19_s19, 6   ;;  %s825_s12 = smov %s599_s13 }
 0x10f   : > { %s826_s13 = smov %s603_s14  ;;  %s827_s14 = smov %s728_s6 }
 0x110   : > { %s828_s15 = smov %s615_s17  ;;  %s829_s16 = smov %s619_s18 }
 0x111   : > { %s830_s17 = smov %s833_s22  ;;  %18 = sbr.rel (!%p16_p4) target bundleno = 7 (0x7), region = 77 }
 0x113   : > { %s831_s18 = smov %s824_s28 }
 0x116   :  { %326 = vsyncpa [#allocation3], 1 }
 0x117   :  { %328 = vsyncpa [#allocation3 + $0x1], 1 }
 0x118   :  { %329 = vsyncpa [#allocation4], 1 }
 0x119   :  { %331 = vsyncpa [#allocation4 + $0x1], 1 }

</bundles_post_ra>
